<compile_context>
chip_gen: v6e
topology: v6e:2x2x1
jax: 0.10.0
libtpu: 0.0.40
codegen_flags: <defaults>
</compile_context>

<pallas_src>
import jax
import jax.numpy as jnp
from jax.experimental import pallas as pl
from jax.experimental.pallas import tpu as pltpu


# ----------------------------- tiling policy ----------------------------------
_SOFT_CAP = 4 << 20   # per-input-block soft cap: (in+out) x 2 buffers ~ 16 MiB (v7x-safe)
_HARD_CAP = 8 << 20   # beyond this even the minimal block risks v7x's 64 MiB VMEM


def _divisors(n):
    return [d for d in range(1, n + 1) if n % d == 0]


def _pick_tiles(b, c_half, hw, itemsize):
    """Pick (q_tile, batch_block). Returns None if even the minimal block is too large
    for a v7x-safe VMEM working set (caller uses the plain-JAX fallback)."""
    sub = max(8, 32 // itemsize)          # sublane packing: 8 f32 / 16 bf16 / 32 int8
    q_cands = sorted({q for q in range(sub, c_half, sub) if c_half % q == 0} | {c_half})
    b_cands = _divisors(b)
    row_bytes = 2 * hw * itemsize         # both shuffle halves of one channel-pair row

    feasible = [(bb * q * row_bytes, q, bb)
                for q in q_cands for bb in b_cands
                if bb * q * row_bytes <= _SOFT_CAP]
    if feasible:
        _, q, bb = max(feasible)          # biggest block within the soft cap
    else:
        q, bb = q_cands[0], 1
        if q * row_bytes > _HARD_CAP:
            return None                   # degenerate huge-hw case

    # Ensure >= 2 grid steps (when possible) so v7x's second TensorCore gets work.
    if (c_half // q) * (b // bb) < 2:
        if bb > 1:
            bb = max(d for d in b_cands if d < bb)
        else:
            smaller = [qq for qq in q_cands if qq < q]
            if smaller:
                q = smaller[-1]
    return q, bb


# ------------------------------- kernel ----------------------------------------
def _sa_kernel(params_ref, x_ref, o_ref):
    """One grid step: `bb` batch elements x one tile of `q_tile` channel-pair rows.

    params_ref : (2, QB, 3) f32 -- per (shuffle-half p, row q): [pA, pB0, pBm] so that
                 gate = sigmoid(pA * rsqrt(var+eps) * (x - mu) + pB0 + pBm * mu),
                 covering channel-attention rows (pA=0, pB0=cbias, pBm=cweight) and
                 per-channel GroupNorm rows (pA=sweight*gamma, pB0=sweight*beta+sbias, pBm=0).
    x_ref      : (BB, 2, QB, hw)  -- dim 1 is the channel_shuffle pair index p.
    o_ref      : (BB, QB, 2*hw)   -- shuffled layout: lanes [p*hw,(p+1)*hw) = pair p.
    """
    hw = x_ref.shape[-1]
    inv_hw = 1.0 / hw
    halves = []
    for p in range(2):                                    # static, unrolled
        pA = params_ref[p, :, 0:1]                        # (QB, 1), already f32
        pB0 = params_ref[p, :, 1:2]
        pBm = params_ref[p, :, 2:3]
        x = x_ref[:, p, :, :].astype(jnp.float32)         # (BB, QB, hw)
        mu = jnp.sum(x, axis=-1, keepdims=True) * inv_hw  # (BB, QB, 1)
        d = x - mu
        var = jnp.sum(d * d, axis=-1, keepdims=True) * inv_hw   # two-pass: no cancellation
        inv = jax.lax.rsqrt(var + 1e-5)
        z = (pA * inv) * d + (pB0 + pBm * mu)             # per-row affine gate argument
        gate = 0.5 * jnp.tanh(0.5 * z) + 0.5              # == sigmoid(z), single EUP op
        halves.append(x * gate)
    # One lane-dense full-width store (no offset / masked partial stores).
    o_ref[...] = jnp.concatenate(halves, axis=-1).astype(o_ref.dtype)
    # NOTE: if traces show the x-DMA exposed on very small blocks, add
    # pipeline_mode=pl.Buffered(3) to the x BlockSpec below (kept at the default depth
    # here for robustness).


# ------------------------------- wrapper ----------------------------------------
def _fold_row_params(params, c, groups):
    """(cg,6)=[cweight,cbias,sweight,sbias,gn_weight,gn_bias] -> (2, c//2, 3) per-row
    affine-gate coefficients in the channel_shuffle-fused row order (works for odd groups)."""
    cg = c // (2 * groups)
    c_half = c // 2
    cw, cb, sw, sb, gamma, beta = (params[:, i].astype(jnp.float32) for i in range(6))
    zeros = jnp.zeros_like(cw)
    chunk_a = jnp.concatenate([zeros, sw * gamma])        # multiplies rsqrt(var+eps)*(x-mu)
    chunk_b0 = jnp.concatenate([cb, sw * beta + sb])      # constant term
    chunk_bm = jnp.concatenate([cw, zeros])               # multiplies the mean
    per_pos = jnp.stack([chunk_a, chunk_b0, chunk_bm], axis=-1)   # (2cg, 3)
    j = jnp.arange(2 * c_half) % (2 * cg)                 # group-position of channel p*c_half+q
    return per_pos[j].reshape(2, c_half, 3)


def _sa_fallback_jax(xg, row_params, out_dtype):
    # TODO(synk): replace with an hw-split Pallas kernel (running s1/s2 over an
    # 'arbitrary' reduction grid axis) for feature maps too large for one VMEM block.
    x = xg.astype(jnp.float32)                            # (b, 2, c_half, hw)
    pA = row_params[:, :, 0][None, :, :, None]
    pB0 = row_params[:, :, 1][None, :, :, None]
    pBm = row_params[:, :, 2][None, :, :, None]
    mu = jnp.mean(x, axis=-1, keepdims=True)
    var = jnp.mean((x - mu) ** 2, axis=-1, keepdims=True)
    z = (pA * jax.lax.rsqrt(var + 1e-5)) * (x - mu) + pB0 + pBm * mu
    y = x * jax.nn.sigmoid(z)
    return jnp.swapaxes(y, 1, 2).astype(out_dtype)        # (b, c_half, 2, hw)


def sa_layer_pallas(x, params, groups):
    """x: (b, c, h, w) NCHW.  params: (cg, 6) columns =
    [cweight, cbias, sweight, sbias, gn_weight, gn_bias], cg = c // (2*groups)."""
    b, c, h, w = x.shape
    assert c % (2 * groups) == 0
    c_half = c // 2
    hw = h * w
    itemsize = jnp.dtype(x.dtype).itemsize

    row_params = _fold_row_params(params, c, groups)      # (2, c_half, 3) f32
    xg = x.reshape(b, 2, c_half, hw)                      # free view; pair index p on dim 1

    tiles = _pick_tiles(b, c_half, hw, itemsize)
    if tiles is None:
        y = _sa_fallback_jax(xg, row_params, x.dtype)
        return y.reshape(b, c, h, w)

    q_tile, bb = tiles
    nq, nb = c_half // q_tile, b // bb
    in_blk_bytes = bb * 2 * q_tile * hw * itemsize
    # Enough for double-buffered in+out blocks, capped v7x-safe (<= 48 MiB of 64 MiB).
    vmem_limit = int(min(48 << 20, max(32 << 20, 6 * in_blk_bytes)))

    out = pl.pallas_call(
        _sa_kernel,
        out_shape=jax.ShapeDtypeStruct((b, c_half, 2 * hw), x.dtype),
        grid_spec=pltpu.PrefetchScalarGridSpec(
            num_scalar_prefetch=0,
            grid=(nq, nb),   # batch innermost: params block index constant -> no re-DMA
            in_specs=[
                pl.BlockSpec((2, q_tile, 3), lambda iq, ib: (0, iq, 0)),
                pl.BlockSpec((bb, 2, q_tile, hw), lambda iq, ib: (ib, 0, iq, 0)),
            ],
            out_specs=pl.BlockSpec((bb, q_tile, 2 * hw), lambda iq, ib: (ib, iq, 0)),
        ),
        compiler_params=pltpu.CompilerParams(
            dimension_semantics=("parallel", "parallel"),
            vmem_limit_bytes=vmem_limit),
    )(row_params, xg)

    # (b, c//2, 2*hw) is exactly the channel-shuffled (b, c, h, w) memory layout.
    return out.reshape(b, c, h, w)


# ------------------------------- reference --------------------------------------
def sa_layer_ref(x, params, groups):
    """Pure-JAX reference mirroring the PyTorch forward exactly."""
    b, c, h, w = x.shape
    cg = c // (2 * groups)
    cweight = params[:, 0][None, :, None, None]
    cbias = params[:, 1][None, :, None, None]
    sweight = params[:, 2][None, :, None, None]
    sbias = params[:, 3][None, :, None, None]
    gamma = params[:, 4][None, :, None, None]
    beta = params[:, 5][None, :, None, None]

    xr = x.reshape(b * groups, -1, h, w)
    x0, x1 = xr[:, :cg], xr[:, cg:]

    xn = jnp.mean(x0, axis=(2, 3), keepdims=True)
    xn = cweight * xn + cbias
    xn = x0 * jax.nn.sigmoid(xn)

    mu = jnp.mean(x1, axis=(2, 3), keepdims=True)
    var = jnp.mean((x1 - mu) ** 2, axis=(2, 3), keepdims=True)
    xs = (x1 - mu) / jnp.sqrt(var + 1e-5) * gamma + beta
    xs = sweight * xs + sbias
    xs = x1 * jax.nn.sigmoid(xs)

    out = jnp.concatenate([xn, xs], axis=1).reshape(b, c, h, w)
    out = out.reshape(b, 2, c // 2, h, w).transpose(0, 2, 1, 3, 4).reshape(b, c, h, w)
    return out


if __name__ == "__main__":
    key = jax.random.PRNGKey(0)
    # Config 1: standard even-groups, lane-aligned spatial (hw = 256).
    # Config 2: odd groups, hw not a multiple of 128, c_half not a multiple of 8.
    for (b, c, h, w, groups) in [(2, 64, 16, 16, 8), (3, 30, 10, 10, 3)]:
        key, kx, kp = jax.random.split(key, 3)
        x = jax.random.normal(kx, (b, c, h, w), dtype=jnp.float32)
        cg = c // (2 * groups)
        # Parameters packed as columns of a (cg, 6) array:
        # [cweight, cbias, sweight, sbias, gn_weight, gn_bias] (synthetic, non-trivial).
        params = jax.random.normal(kp, (cg, 6), dtype=jnp.float32) * 0.5

        out = jax.block_until_ready(sa_layer_pallas(x, params, groups))
        ref = jax.block_until_ready(sa_layer_ref(x, params, groups))

        assert out.shape == (b, c, h, w)
        err = float(jnp.max(jnp.abs(out - ref)))
        assert jnp.allclose(out, ref, rtol=1e-5, atol=1e-5), err
    print("KERNEL_OK")
</pallas_src>

<mosaic_0001>
module attributes {stable_mosaic.version = 11 : i64} {
  func.func @_sa_kernel(%arg0: i32, %arg1: i32, %arg2: memref<2x32x3xf32, #tpu.memory_space<vmem>>, %arg3: memref<1x2x32x256xf32, #tpu.memory_space<vmem>>, %arg4: memref<1x32x512xf32, #tpu.memory_space<vmem>>) attributes {dimension_semantics = [#tpu.dimension_semantics<parallel>, #tpu.dimension_semantics<parallel>], iteration_bounds = array<i64: 1, 2>, scalar_prefetch = 0 : i64, scratch_operands = 0 : i64, tpu.core_type = #tpu.core_type<tc>, window_params = [{transform_indices = @transform_0, window_bounds = array<i64: 2, 32, 3>}, {transform_indices = @transform_1, window_bounds = array<i64: 1, 2, 32, 256>}, {transform_indices = @transform_2, window_bounds = array<i64: 1, 32, 512>}]} {
    %c0 = arith.constant 0 : index
    %c0_0 = arith.constant 0 : index
    %c0_1 = arith.constant 0 : index
    %0 = vector.load %arg2[%c0, %c0_0, %c0_1] : memref<2x32x3xf32, #tpu.memory_space<vmem>>, vector<1x32x1xf32>
    %1 = vector.shape_cast %0 : vector<1x32x1xf32> to vector<32x1xf32>
    %c0_2 = arith.constant 0 : index
    %c0_3 = arith.constant 0 : index
    %c1 = arith.constant 1 : index
    %2 = vector.load %arg2[%c0_2, %c0_3, %c1] : memref<2x32x3xf32, #tpu.memory_space<vmem>>, vector<1x32x1xf32>
    %3 = vector.shape_cast %2 : vector<1x32x1xf32> to vector<32x1xf32>
    %c0_4 = arith.constant 0 : index
    %c0_5 = arith.constant 0 : index
    %c2 = arith.constant 2 : index
    %4 = vector.load %arg2[%c0_4, %c0_5, %c2] : memref<2x32x3xf32, #tpu.memory_space<vmem>>, vector<1x32x1xf32>
    %5 = vector.shape_cast %4 : vector<1x32x1xf32> to vector<32x1xf32>
    %c0_6 = arith.constant 0 : index
    %c0_7 = arith.constant 0 : index
    %c0_8 = arith.constant 0 : index
    %c0_9 = arith.constant 0 : index
    %6 = vector.load %arg3[%c0_6, %c0_7, %c0_8, %c0_9] : memref<1x2x32x256xf32, #tpu.memory_space<vmem>>, vector<1x1x32x256xf32>
    %7 = vector.shape_cast %6 : vector<1x1x32x256xf32> to vector<1x32x256xf32>
    %cst = arith.constant dense<0.000000e+00> : vector<1x32xf32>
    %8 = vector.multi_reduction <add>, %7, %cst [2] : vector<1x32x256xf32> to vector<1x32xf32>
    %9 = vector.shape_cast %8 : vector<1x32xf32> to vector<1x32x1xf32>
    %cst_10 = arith.constant 3.906250e-03 : f32
    %10 = vector.broadcast %cst_10 : f32 to vector<1x32x1xf32>
    %11 = arith.mulf %9, %10 : vector<1x32x1xf32>
    %12 = vector.broadcast %11 : vector<1x32x1xf32> to vector<1x32x256xf32>
    %13 = arith.subf %7, %12 : vector<1x32x256xf32>
    %14 = arith.mulf %13, %13 : vector<1x32x256xf32>
    %cst_11 = arith.constant dense<0.000000e+00> : vector<1x32xf32>
    %15 = vector.multi_reduction <add>, %14, %cst_11 [2] : vector<1x32x256xf32> to vector<1x32xf32>
    %16 = vector.shape_cast %15 : vector<1x32xf32> to vector<1x32x1xf32>
    %cst_12 = arith.constant 3.906250e-03 : f32
    %17 = vector.broadcast %cst_12 : f32 to vector<1x32x1xf32>
    %18 = arith.mulf %16, %17 : vector<1x32x1xf32>
    %cst_13 = arith.constant 9.99999974E-6 : f32
    %19 = vector.broadcast %cst_13 : f32 to vector<1x32x1xf32>
    %20 = arith.addf %18, %19 : vector<1x32x1xf32>
    %21 = math.rsqrt %20 : vector<1x32x1xf32>
    %22 = vector.shape_cast %1 : vector<32x1xf32> to vector<1x32x1xf32>
    %23 = arith.mulf %22, %21 : vector<1x32x1xf32>
    %24 = vector.broadcast %23 : vector<1x32x1xf32> to vector<1x32x256xf32>
    %25 = arith.mulf %24, %13 : vector<1x32x256xf32>
    %26 = vector.shape_cast %5 : vector<32x1xf32> to vector<1x32x1xf32>
    %27 = arith.mulf %26, %11 : vector<1x32x1xf32>
    %28 = vector.shape_cast %3 : vector<32x1xf32> to vector<1x32x1xf32>
    %29 = arith.addf %28, %27 : vector<1x32x1xf32>
    %30 = vector.broadcast %29 : vector<1x32x1xf32> to vector<1x32x256xf32>
    %31 = arith.addf %25, %30 : vector<1x32x256xf32>
    %cst_14 = arith.constant 5.000000e-01 : f32
    %32 = vector.broadcast %cst_14 : f32 to vector<1x32x256xf32>
    %33 = arith.mulf %32, %31 : vector<1x32x256xf32>
    %34 = math.tanh %33 : vector<1x32x256xf32>
    %cst_15 = arith.constant 5.000000e-01 : f32
    %35 = vector.broadcast %cst_15 : f32 to vector<1x32x256xf32>
    %36 = arith.mulf %35, %34 : vector<1x32x256xf32>
    %cst_16 = arith.constant 5.000000e-01 : f32
    %37 = vector.broadcast %cst_16 : f32 to vector<1x32x256xf32>
    %38 = arith.addf %36, %37 : vector<1x32x256xf32>
    %39 = arith.mulf %7, %38 : vector<1x32x256xf32>
    %c1_17 = arith.constant 1 : index
    %c0_18 = arith.constant 0 : index
    %c0_19 = arith.constant 0 : index
    %40 = vector.load %arg2[%c1_17, %c0_18, %c0_19] : memref<2x32x3xf32, #tpu.memory_space<vmem>>, vector<1x32x1xf32>
    %41 = vector.shape_cast %40 : vector<1x32x1xf32> to vector<32x1xf32>
    %c1_20 = arith.constant 1 : index
    %c0_21 = arith.constant 0 : index
    %c1_22 = arith.constant 1 : index
    %42 = vector.load %arg2[%c1_20, %c0_21, %c1_22] : memref<2x32x3xf32, #tpu.memory_space<vmem>>, vector<1x32x1xf32>
    %43 = vector.shape_cast %42 : vector<1x32x1xf32> to vector<32x1xf32>
    %c1_23 = arith.constant 1 : index
    %c0_24 = arith.constant 0 : index
    %c2_25 = arith.constant 2 : index
    %44 = vector.load %arg2[%c1_23, %c0_24, %c2_25] : memref<2x32x3xf32, #tpu.memory_space<vmem>>, vector<1x32x1xf32>
    %45 = vector.shape_cast %44 : vector<1x32x1xf32> to vector<32x1xf32>
    %c0_26 = arith.constant 0 : index
    %c1_27 = arith.constant 1 : index
    %c0_28 = arith.constant 0 : index
    %c0_29 = arith.constant 0 : index
    %46 = vector.load %arg3[%c0_26, %c1_27, %c0_28, %c0_29] : memref<1x2x32x256xf32, #tpu.memory_space<vmem>>, vector<1x1x32x256xf32>
    %47 = vector.shape_cast %46 : vector<1x1x32x256xf32> to vector<1x32x256xf32>
    %cst_30 = arith.constant dense<0.000000e+00> : vector<1x32xf32>
    %48 = vector.multi_reduction <add>, %47, %cst_30 [2] : vector<1x32x256xf32> to vector<1x32xf32>
    %49 = vector.shape_cast %48 : vector<1x32xf32> to vector<1x32x1xf32>
    %cst_31 = arith.constant 3.906250e-03 : f32
    %50 = vector.broadcast %cst_31 : f32 to vector<1x32x1xf32>
    %51 = arith.mulf %49, %50 : vector<1x32x1xf32>
    %52 = vector.broadcast %51 : vector<1x32x1xf32> to vector<1x32x256xf32>
    %53 = arith.subf %47, %52 : vector<1x32x256xf32>
    %54 = arith.mulf %53, %53 : vector<1x32x256xf32>
    %cst_32 = arith.constant dense<0.000000e+00> : vector<1x32xf32>
    %55 = vector.multi_reduction <add>, %54, %cst_32 [2] : vector<1x32x256xf32> to vector<1x32xf32>
    %56 = vector.shape_cast %55 : vector<1x32xf32> to vector<1x32x1xf32>
    %cst_33 = arith.constant 3.906250e-03 : f32
    %57 = vector.broadcast %cst_33 : f32 to vector<1x32x1xf32>
    %58 = arith.mulf %56, %57 : vector<1x32x1xf32>
    %cst_34 = arith.constant 9.99999974E-6 : f32
    %59 = vector.broadcast %cst_34 : f32 to vector<1x32x1xf32>
    %60 = arith.addf %58, %59 : vector<1x32x1xf32>
    %61 = math.rsqrt %60 : vector<1x32x1xf32>
    %62 = vector.shape_cast %41 : vector<32x1xf32> to vector<1x32x1xf32>
    %63 = arith.mulf %62, %61 : vector<1x32x1xf32>
    %64 = vector.broadcast %63 : vector<1x32x1xf32> to vector<1x32x256xf32>
    %65 = arith.mulf %64, %53 : vector<1x32x256xf32>
    %66 = vector.shape_cast %45 : vector<32x1xf32> to vector<1x32x1xf32>
    %67 = arith.mulf %66, %51 : vector<1x32x1xf32>
    %68 = vector.shape_cast %43 : vector<32x1xf32> to vector<1x32x1xf32>
    %69 = arith.addf %68, %67 : vector<1x32x1xf32>
    %70 = vector.broadcast %69 : vector<1x32x1xf32> to vector<1x32x256xf32>
    %71 = arith.addf %65, %70 : vector<1x32x256xf32>
    %cst_35 = arith.constant 5.000000e-01 : f32
    %72 = vector.broadcast %cst_35 : f32 to vector<1x32x256xf32>
    %73 = arith.mulf %72, %71 : vector<1x32x256xf32>
    %74 = math.tanh %73 : vector<1x32x256xf32>
    %cst_36 = arith.constant 5.000000e-01 : f32
    %75 = vector.broadcast %cst_36 : f32 to vector<1x32x256xf32>
    %76 = arith.mulf %75, %74 : vector<1x32x256xf32>
    %cst_37 = arith.constant 5.000000e-01 : f32
    %77 = vector.broadcast %cst_37 : f32 to vector<1x32x256xf32>
    %78 = arith.addf %76, %77 : vector<1x32x256xf32>
    %79 = arith.mulf %47, %78 : vector<1x32x256xf32>
    %80 = tpu.concatenate %39, %79 in 2 : vector<1x32x256xf32>, vector<1x32x256xf32> -> vector<1x32x512xf32>
    %c0_38 = arith.constant 0 : index
    %c0_39 = arith.constant 0 : index
    %c0_40 = arith.constant 0 : index
    %81 = vector.load %arg4[%c0_38, %c0_39, %c0_40] : memref<1x32x512xf32, #tpu.memory_space<vmem>>, vector<1x32x512xf32>
    tpu.vector_store %arg4[%c0_38, %c0_39, %c0_40], %80 {strides = array<i32>} : memref<1x32x512xf32, #tpu.memory_space<vmem>>, vector<1x32x512xf32>,
    return
  }
  func.func @transform_0(%arg0: i32, %arg1: i32) -> (i32, i32, i32) {
    %c0_i32 = arith.constant 0 : i32
    %c0_i32_0 = arith.constant 0 : i32
    %c0_i32_1 = arith.constant 0 : i32
    return %c0_i32, %arg0, %c0_i32_0 : i32, i32, i32
  }
  func.func @transform_1(%arg0: i32, %arg1: i32) -> (i32, i32, i32, i32) {
    %c0_i32 = arith.constant 0 : i32
    %c0_i32_0 = arith.constant 0 : i32
    %c0_i32_1 = arith.constant 0 : i32
    return %arg1, %c0_i32, %arg0, %c0_i32_0 : i32, i32, i32, i32
  }
  func.func @transform_2(%arg0: i32, %arg1: i32) -> (i32, i32, i32) {
    %c0_i32 = arith.constant 0 : i32
    %c0_i32_0 = arith.constant 0 : i32
    return %arg1, %arg0, %c0_i32 : i32, i32, i32
  }
}

</mosaic_0001>

<bundles_post_ra>
// kernel: tpu_custom_call.1
= control target key start
LH: loop header
LB: loop body
LE: loop exit
PB: predicated region body
PF: predicated region fallthrough
CT: control target
= control target key end

     0   :  { %7 = vsyncpa [#allocation3], 0  ;;  %s1418_s0 = inlined_call_operand.vmem [shape: f32[2,32,3], index: 0, kind: input, shape index: {}]   ;;  %s1419_s1 = inlined_call_operand.hbm [shape: f32[2,2,32,256], index: 1, kind: input, shape index: {}]   ;;  %s1420_s2 = inlined_call_operand.hbm [shape: f32[2,32,512], index: 2, kind: output, shape index: {}]  }
   0x1   :  { %9 = vsyncpa [#allocation3 + $0x1], 0 }
   0x2   :  { %10 = vsyncpa [#allocation4], 0 }
   0x3   :  { %12 = vsyncpa [#allocation4 + $0x1], 0  ;;  %s1013_s9 = smov 0   ;;  %s1015_s10 = smov 0  }
   0x4   :  { %s1017_s11 = smov 0   ;;  %s1019_s12 = smov 0  }
   0x5   :  { %s1021_s13 = smov 0   ;;  %s1023_s14 = smov 0  }
   0x6 LB: > { %s726_s15 = sadd.s32 4294967295, %s987_s14   ;;  %s727_s16 = sadd.s32 4294967294, %s987_s14   ;;  %s987_s14 = sphi %s1023_s14, %s18_s14   ;;  %s983_s13 = sphi %s1021_s13, %s1431_s13   ;;  %s979_s12 = sphi %s1019_s12, %s1430_s12   ;;  %s975_s11 = sphi %s1017_s11, %s1429_s11   ;;  %s971_s10 = sphi %s1015_s10, %s1428_s10   ;;  %s967_s9 = sphi %s1013_s9, %s1427_s9  }
   0x7   : > { %s27_s17 = sadd.s32 1, %s983_s13  ;;  %s65_s18 = sadd.s32 1, %s975_s11 }
   0x8   : > { %p28_p0 = scmp.ge.s32.totalorder %s27_s17, 2  ;;  %p72_p1 = scmp.ne.s32.totalorder %s975_s11, %s971_s10 }
   0x9   : > { %p73_p2 = scmp.eq.s32.totalorder %s987_s14, 0  ;;  %p78_p3 = scmp.ne.s32.totalorder %s971_s10, %s967_s9 }
   0xa   : > { %s1433_s17 = smov (%p28_p0, %s27_s17), 0  ;;  %p79_p5 = scmp.eq.s32.totalorder %s726_s15, 0 }
   0xb   : > { %p1054_p4 = por %p73_p2, %p72_p1  ;;  %s60_s20 = ssub.s32 %s983_s13, %s1433_s17 }
   0xc   : > { %p104_p6 = scmp.eq.s32.totalorder %s726_s15, 1  ;;  %p63_p7 = scmp.eq.s32.totalorder %s60_s20, 0 }
   0xd   : > { %p1060_p8 = por %p79_p5, %p78_p3  ;;  %p110_p10 = scmp.eq.s32.totalorder %s727_s16, 1 }
   0xe   : > { %p1064_p9 = por %p104_p6, %p72_p1  ;;  %p768_p13 = scmp.lt.s32.totalorder %s987_s14, 2 }
   0xf   : > { %s1069_s23 = scalar_select %p63_p7, %s975_s11, %s65_s18  }
  0x10   : > { %p1071_p11 = por %p110_p10, %p78_p3  ;;  %s139_s25 = sand.u32 1, %s975_s11  }
  0x11   : > { %s731_s26 = sshll.u32 %s139_s25, 7  ;;  %s754_s27 = sshll.u32 %s983_s13, 11 }
  0x12   : > { %s152_s30 = scalar_lea.hbm %s1419_s1, %s754_s27  ;;  %s143_s3 = scalar_lea.vmem [#allocation2], %s731_s26 }
  0x13   : > { %s153_s4 = sshll.u32 %s143_s3, 4  ;;  %p1084_p0 = pnand %p768_p13, %p1054_p4  ;;  %s154_s4 = int_to_ptr.vmem [resolvable:$true] %s153_s4 }
  0x14   : > { %p734_p1 = scmp.ge.s32.totalorder %s987_s14, 1  ;;  %s140_s6 = scalar_lea.sflag [#allocation3], %s139_s25 }
  0x15   : > { %p881_p2 = pneg %p1084_p0  ;;  %s892_s7 = scalar_lea.vmem %s154_s4, 2048 }
  0x16   : > { %p893_p3 = scmp.ne.s32.totalorder %s154_s4, %s892_s7  ;;  %s989_s8 = smov [#allocation2]  }
  0x17   : > { %s897_s15 = sshll.u32 %s989_s8, 4  ;;  %s898_s15 = int_to_ptr.vmem [resolvable:$false] %s897_s15 }
  0x18   : > { %p895_p5 = pnand %p893_p3, %p881_p2  ;;  %s899_s16 = scalar_lea.vmem %s898_s15, 4096 }
  0x19   : > { %p900_p7 = scmp.lt.s32.totalorder %s154_s4, %s898_s15  ;;  %p901_p10 = scmp.lt.s32.totalorder %s899_s16, %s892_s7 }
  0x1a   : > { %p896_p6 = pneg %p895_p5 }
  0x1b   : > { %p902_p12 = por %p901_p10, %p900_p7 }
  0x1d   : > { %p903_p4 = pnand %p902_p12, %p896_p6 }
  0x1f   : > { %906 = shalt.err (!%p903_p4)
}
  0x20   : > { %s990_s18 = smov 256   ;;  %s991_s19 = smov 16  }
  0x21   : > { %763 = dma.hbm_to_vmem [thread:$0]  (!%p1084_p0), %s152_s30, 2048, %s154_s4, %s140_s6, %s990_s18, %s990_s18, %s991_s19  }
  0x22   : > { %p161_p13 = scmp.lt.s32.totalorder %s987_s14, 3 }
  0x24   : > { %p162_p2 = pnand %p734_p1, %p161_p13 }
  0x25   : > { %s1097_s20 = sand.u32 (!%p162_p2), 1, %s971_s10  }
  0x26   : > { %165 = sbr.rel (%p162_p2) target bundleno = 624 (0x270), region = 28  ;;  %s735_s25 = sshll.u32 (!%p162_p2), %s1097_s20, 7 }
  0x27   : > { %s168_s26 = scalar_lea.sflag (!%p162_p2), [#allocation3], %s1097_s20  ;;  %s171_s27 = scalar_lea.vmem (!%p162_p2), [#allocation2], %s735_s25 }
  0x2b   : > { %958 = dma.done.wait (%p1060_p8), %s168_s26, 2048  }
  0x2c   : > { %960 = vsyncadd (%p1060_p8), %s168_s26, 4294965248  ;;  %v1107_v0 = vld [vmem:[%s171_s27] sm:$0xff]  ;;  %v1109_v1 = vld [vmem:[%s171_s27 + $0x8] sm:$0xff]  ;;  %v992_v24 = vmov 1   ;;  %s993_s3 = smov 127   ;;  %s1327_s28 = scalar_lea.vmem [#allocation5], %s735_s25 }
  0x2d   : > { %v1111_v2 = vld [vmem:[%s171_s27 + $0x10] sm:$0xff]  ;;  %v217_v3 = vadd.f32 %v1109_v1, %v1107_v0  ;;  %v1115_v4 = vld [vmem:[%s171_s27 + $0x18] sm:$0xff]  ;;  %v1117_v5 = vld [vmem:[%s171_s27 + $0x20] sm:$0xff]  ;;  %826 = vset.pattern.permute.xlu0 %v992_v24  ;;  %825 = vset.pattern.permute.xlu1 %v992_v24  ;;  %s755_s25 = sshll.u32 %s979_s12, 11  ;;  %s624_s29 = sshll.u32 %s1327_s28, 4  ;;  %s1367_s29 = int_to_ptr.vmem [resolvable:$true] %s624_s29 }
  0x2e   : > { %v1119_v6 = vld [vmem:[%s171_s27 + $0x28] sm:$0xff]  ;;  %v1123_v8 = vld [vmem:[%s171_s27 + $0x30] sm:$0xff]  ;;  %v1125_v9 = vld [vmem:[%s171_s27 + $0x38] sm:$0xff]  ;;  %v220_v10 = vadd.f32 %v1115_v4, %v1111_v2  ;;  %s1365_s4 = scalar_lea.hbm %s1420_s2, %s755_s25  ;;  %s608_s12 = scalar_lea.sflag [#allocation4], %s1097_s20 }
  0x2f   : > { %v223_v7 = vadd.f32 %v1119_v6, %v1117_v5  ;;  %218 = vadd.xlane.f32.xlu0 %v217_v3  ;;  %v226_v11 = vadd.f32 %v1125_v9, %v1123_v8  ;;  %v1131_v12 = vld [vmem:[%s171_s27 + $0x40] sm:$0xff]  ;;  %v1133_v13 = vld [vmem:[%s171_s27 + $0x48] sm:$0xff]  ;;  %v1135_v14 = vld [vmem:[%s171_s27 + $0x50] sm:$0xff]  ;;  %s907_s5 = scalar_lea.vmem %s1367_s29, 2048  ;;  %s995_s6 = smov [#allocation5]  }
  0x30   : > { %v1137_v15 = vld [vmem:[%s171_s27 + $0x58] sm:$0xff]  ;;  %v411_v16 = vadd.f32 %v1133_v13, %v1131_v12  ;;  %v1141_v17 = vld [vmem:[%s171_s27 + $0x60] sm:$0xff]  ;;  %v1143_v18 = vld [vmem:[%s171_s27 + $0x68] sm:$0xff]  ;;  %p908_p8 = scmp.ne.s32.totalorder %s1367_s29, %s907_s5  ;;  %s911_s7 = sshll.u32 %s995_s6, 4  ;;  %s912_s7 = int_to_ptr.vmem [resolvable:$false] %s911_s7 }
  0x31   : > { %224 = vadd.xlane.f32.xlu1 %v223_v7  ;;  %v414_v19 = vadd.f32 %v1137_v15, %v1135_v14  ;;  %v1147_v20 = vld [vmem:[%s171_s27 + $0x70] sm:$0xff]  ;;  %v1149_v21 = vld [vmem:[%s171_s27 + $0x78] sm:$0xff]  ;;  %v417_v22 = vadd.f32 %v1143_v18, %v1141_v17  ;;  %v1160_v26 = vld [vmem:[%s1418_s0] sm:$0xff]  ;;  %s913_s8 = scalar_lea.vmem %s912_s7, 4096  ;;  %p914_p1 = scmp.lt.s32.totalorder %s1367_s29, %s912_s7 }
  0x32   : > { %v420_v23 = vadd.f32 %v1149_v21, %v1147_v20  ;;  %v1166_v31 = vld [vmem:[%s1418_s0 + $0x8] sm:$0xff]  ;;  %v1172_v35 = vld [vmem:[%s1418_s0 + $0x10] sm:$0xff]  ;;  %v1180_v39 = vld [vmem:[%s1418_s0 + $0x18] sm:$0xff]  ;;  %p909_p12 = pnand %p908_p8, %p1064_p9  ;;  %p915_p3 = scmp.lt.s32.totalorder %s913_s8, %s907_s5 }
  0x33   : > { %221 = vadd.xlane.f32.xlu0 %v220_v10 }
  0x34   : > { %p910_p0 = pneg %p909_p12  ;;  %p916_p5 = por %p915_p3, %p914_p1 }
  0x35   : > { %227 = vadd.xlane.f32.xlu1 %v226_v11 }
  0x36   : > { %p917_p6 = pnand %p916_p5, %p910_p0 }
  0x37   : > { %412 = vadd.xlane.f32.xlu0 %v411_v16 }
  0x39   : > { %415 = vadd.xlane.f32.xlu1 %v414_v19 }
  0x3b   : > { %418 = vadd.xlane.f32.xlu0 %v417_v22 }
  0x3d   : > { %421 = vadd.xlane.f32.xlu1 %v420_v23 }
  0xb8   : > { %v219_v25 = vpop.xlane.xlu0 %218 }
  0xb9   : > { %v229_v27 = vmul.f32 0.00390625, %v219_v25 }
  0xba   : > { %v225_v28 = vpop.xlane.xlu1 %224 }
  0xbb   : > { %v305_v29 = vmul.f32 %v229_v27, %v1160_v26  ;;  %v231_v33 = vmul.f32 0.00390625, %v225_v28  ;;  %v1186_v42 = vsub.f32 %v1107_v0, %v229_v27  ;;  %v1189_v43 = vsub.f32 %v1109_v1, %v229_v27 }
  0xbc   : > { %v222_v30 = vpop.xlane.xlu0 %221 }
  0xbd   : > { %v230_v32 = vmul.f32 0.00390625, %v222_v30  ;;  %313 = vrot.lane.b32.xlu0 %v305_v29, %s993_s3  ;;  %v307_v38 = vmul.f32 %v231_v33, %v1172_v35  ;;  %v1192_v46 = vsub.f32 %v1117_v5, %v231_v33  ;;  %v1195_v47 = vsub.f32 %v1119_v6, %v231_v33 }
  0xbe   : > { %v228_v34 = vpop.xlane.xlu1 %227  ;;  %v241_v48 = vmul.f32 %v1186_v42, %v1186_v42  ;;  %v242_v49 = vmul.f32 %v1189_v43, %v1189_v43 }
  0xbf   : > { %v306_v36 = vmul.f32 %v230_v32, %v1166_v31  ;;  %v232_v37 = vmul.f32 0.00390625, %v228_v34  ;;  %v245_v54 = vmul.f32 %v1192_v46, %v1192_v46  ;;  %v246_v55 = vmul.f32 %v1195_v47, %v1195_v47 }
  0xc0   : > { %v413_v41 = vpop.xlane.xlu0 %412  ;;  %v249_v53 = vadd.f32 %v242_v49, %v241_v48  ;;  %v1226_v7 = vsub.f32 %v1111_v2, %v230_v32  ;;  %v1229_v10 = vsub.f32 %v1115_v4, %v230_v32  ;;  %v1271_v48 = vld [vmem:[%s1418_s0 + $0x28] sm:$0xff] }
  0xc1   : > { %315 = vrot.lane.b32.xlu1 %v306_v36, %s993_s3  ;;  %v308_v40 = vmul.f32 %v232_v37, %v1180_v39  ;;  %v423_v44 = vmul.f32 0.00390625, %v413_v41  ;;  %v255_v60 = vadd.f32 %v246_v55, %v245_v54  ;;  %v1232_v19 = vsub.f32 %v1123_v8, %v232_v37  ;;  %v1264_v41 = vld [vmem:[%s1418_s0 + $0x30] sm:$0xff] }
  0xc2   : > { %v416_v3 = vpop.xlane.xlu1 %415  ;;  %v1235_v22 = vsub.f32 %v1125_v9, %v232_v37  ;;  %v243_v23 = vmul.f32 %v1226_v7, %v1226_v7  ;;  %v244_v25 = vmul.f32 %v1229_v10, %v1229_v10 }
  0xc3   : > { %v1202_v50 = vsub.f32 %v1131_v12, %v423_v44  ;;  %v1205_v51 = vsub.f32 %v1133_v13, %v423_v44  ;;  %v424_v16 = vmul.f32 0.00390625, %v416_v3  ;;  %v247_v30 = vmul.f32 %v1232_v19, %v1232_v19 }
  0xc4   : > { %v419_v45 = vpop.xlane.xlu0 %418  ;;  %v252_v29 = vadd.f32 %v244_v25, %v243_v23  ;;  %v248_v32 = vmul.f32 %v1235_v22, %v1235_v22 }
  0xc5   : > { %317 = vrot.lane.b32.xlu1 %v307_v38, %s993_s3  ;;  %v425_v52 = vmul.f32 0.00390625, %v419_v45  ;;  %v435_v58 = vmul.f32 %v1202_v50, %v1202_v50  ;;  %v436_v59 = vmul.f32 %v1205_v51, %v1205_v51  ;;  %v1242_v27 = vsub.f32 %v1135_v14, %v424_v16  ;;  %v1258_v38 = vld [vmem:[%s1418_s0 + $0x20] sm:$0xff] }
  0xc6   : > { %v1245_v28 = vsub.f32 %v1137_v15, %v424_v16  ;;  %v258_v36 = vadd.f32 %v248_v32, %v247_v30  ;;  %v500_v49 = vmul.f32 %v1271_v48, %v424_v16 }
  0xc7   : > { %v1212_v56 = vsub.f32 %v1141_v17, %v425_v52  ;;  %v1215_v57 = vsub.f32 %v1143_v18, %v425_v52  ;;  %v443_v61 = vadd.f32 %v436_v59, %v435_v58  ;;  %v437_v33 = vmul.f32 %v1242_v27, %v1242_v27 }
  0xc8   : > { %v438_v34 = vmul.f32 %v1245_v28, %v1245_v28  ;;  %v501_v45 = vmul.f32 %v1264_v41, %v425_v52 }
  0xc9   : > { %319 = vrot.lane.b32.xlu1 %v308_v40, %s993_s3  ;;  %v439_v62 = vmul.f32 %v1212_v56, %v1212_v56  ;;  %v440_v63 = vmul.f32 %v1215_v57, %v1215_v57  ;;  %v499_v40 = vmul.f32 %v1258_v38, %v423_v44  ;;  %v422_v44 = vpop.xlane.xlu1 %421 }
  0xca   : > { %v446_v37 = vadd.f32 %v438_v34, %v437_v33 }
  0xcb   : > { %v449_v11 = vadd.f32 %v440_v63, %v439_v62  ;;  %v1290_v62 = vld [vmem:[%s1418_s0 + $0x38] sm:$0xff] }
  0xdc   : > { %250 = vadd.xlane.f32.xlu0 %v249_v53  ;;  %v426_v53 = vmul.f32 0.00390625, %v422_v44 }
  0xde   : > { %v1277_v54 = vsub.f32 %v1147_v20, %v426_v53  ;;  %v1280_v55 = vsub.f32 %v1149_v21, %v426_v53  ;;  %v502_v63 = vmul.f32 %v1290_v62, %v426_v53 }
  0xe0   : > { %256 = vadd.xlane.f32.xlu0 %v255_v60  ;;  %v441_v52 = vmul.f32 %v1277_v54, %v1277_v54  ;;  %v442_v58 = vmul.f32 %v1280_v55, %v1280_v55 }
  0xe2   : > { %v452_v59 = vadd.f32 %v442_v58, %v441_v52 }
  0xe4   : > { %444 = vadd.xlane.f32.xlu0 %v443_v61 }
  0xe8   : > { %450 = vadd.xlane.f32.xlu0 %v449_v11 }
  0xed   : > { %253 = vadd.xlane.f32.xlu1 %v252_v29 }
  0xf1   : > { %259 = vadd.xlane.f32.xlu1 %v258_v36 }
  0xf5   : > { %447 = vadd.xlane.f32.xlu1 %v446_v37 }
  0xfe   : > { %507 = vrot.lane.b32.xlu0 %v499_v40, %s993_s3 }
 0x102   : > { %511 = vrot.lane.b32.xlu0 %v501_v45, %s993_s3 }
 0x106   : > { %509 = vrot.lane.b32.xlu1 %v500_v49, %s993_s3 }
 0x12a   : > { %453 = vadd.xlane.f32.xlu1 %v452_v59 }
 0x12f   : > { %v314_v3 = vpop.permute.xlu0 %313 }
 0x130   : > { %v325_v16 = vadd.f32 %v314_v3, %v1160_v26 }
 0x133   : > { %v316_v60 = vpop.permute.xlu1 %315 }
 0x134   : > { %v326_v61 = vadd.f32 %v316_v60, %v1166_v31 }
 0x136   : > { %336 = vperm.xlu0 %826, %v326_v61  }
 0x137   : > { %v318_v11 = vpop.permute.xlu1 %317 }
 0x138   : > { %v327_v23 = vadd.f32 %v318_v11, %v1172_v35 }
 0x13b   : > { %513 = vrot.lane.b32.xlu1 %v502_v63, %s993_s3  ;;  %v320_v25 = vpop.permute.xlu1 %319 }
 0x13c   : > { %v328_v29 = vadd.f32 %v320_v25, %v1180_v39 }
 0x13f   : > { %331 = vperm.xlu1 %825, %v325_v16  }
 0x143   : > { %341 = vperm.xlu1 %825, %v327_v23   ;;  %v994_v23 = vmov 0  }
 0x147   : > { %346 = vperm.xlu1 %825, %v328_v29  }
 0x165   : > { %v251_v30 = vpop.xlane.xlu0 %250 }
 0x166   : > { %v261_v32 = vmul.f32 0.00390625, %v251_v30 }
 0x168   : > { %v265_v33 = vadd.f32 1e-05, %v261_v32 }
 0x169   : > { %v257_v34 = vpop.xlane.xlu0 %256 }
 0x16a   : > { %831 = vrsqrt.f32 %v265_v33  ;;  %v263_v40 = vmul.f32 0.00390625, %v257_v34 }
 0x16c   : > { %v267_v59 = vadd.f32 1e-05, %v263_v40 }
 0x16d   : > { %v445_v36 = vpop.xlane.xlu0 %444 }
 0x16e   : > { %v455_v49 = vmul.f32 0.00390625, %v445_v36 }
 0x170   : > { %v459_v61 = vadd.f32 1e-05, %v455_v49 }
 0x171   : > { %v451_v37 = vpop.xlane.xlu0 %450 }
 0x172   : > { %v457_v63 = vmul.f32 0.00390625, %v451_v37 }
 0x174   : > { %v461_v29 = vadd.f32 1e-05, %v457_v63 }
 0x175   : > { %v508_v45 = vpop.permute.xlu0 %507 }
 0x176   : > { %v519_v44 = vadd.f32 %v1258_v38, %v508_v45  ;;  %v254_v53 = vpop.xlane.xlu1 %253 }
 0x177   : > { %v262_v52 = vmul.f32 0.00390625, %v254_v53  ;;  %v832_v58 = vpop.eup %831 }
 0x178   : > { %525 = vperm.xlu0 %826, %v519_v44   ;;  %v273_v16 = vmul.f32 %v832_v58, %v1160_v26 }
 0x179   : > { %v266_v60 = vadd.f32 1e-05, %v262_v52 }
 0x17a   : > { %v260_v3 = vpop.xlane.xlu1 %259 }
 0x17b   : > { %833 = vrsqrt.f32 %v266_v60  ;;  %v264_v11 = vmul.f32 0.00390625, %v260_v3 }
 0x17c   : > { %827 = vset.pattern.permute.xlu0 %v994_v23  ;;  %835 = vrsqrt.f32 %v267_v59 }
 0x17d   : > { %v268_v25 = vadd.f32 1e-05, %v264_v11  ;;  %279 = vperm.xlu0 %827, %v273_v16   ;;  %837 = vrsqrt.f32 %v459_v61  ;;  %v512_v16 = vpop.permute.xlu0 %511 }
 0x17e   : > { %v448_v30 = vpop.xlane.xlu1 %447 }
 0x17f   : > { %839 = vrsqrt.f32 %v268_v25  ;;  %v456_v32 = vmul.f32 0.00390625, %v448_v30 }
 0x180   : > { %841 = vrsqrt.f32 %v461_v29 }
 0x181   : > { %v460_v33 = vadd.f32 1e-05, %v456_v32 }
 0x182   : > { %v510_v34 = vpop.permute.xlu1 %509 }
 0x183   : > { %843 = vrsqrt.f32 %v460_v33  ;;  %v520_v36 = vadd.f32 %v1271_v48, %v510_v34 }
 0x185   : > { %530 = vperm.xlu1 %825, %v520_v36  }
 0x188   : > { %v834_v37 = vpop.eup %833 }
 0x189   : > { %828 = vset.pattern.permute.xlu1 %v994_v23  ;;  %v274_v26 = vmul.f32 %v834_v37, %v1166_v31  ;;  %v836_v40 = vpop.eup %835 }
 0x18a   : > { %v838_v45 = vpop.eup %837  ;;  %v275_v44 = vmul.f32 %v836_v40, %v1172_v35 }
 0x18b   : > { %284 = vperm.xlu1 %828, %v274_v26   ;;  %v467_v58 = vmul.f32 %v838_v45, %v1258_v38 }
 0x18c   : > { %v840_v49 = vpop.eup %839 }
 0x18d   : > { %v276_v53 = vmul.f32 %v840_v49, %v1180_v39  ;;  %v842_v52 = vpop.eup %841 }
 0x18e   : > { %v469_v31 = vmul.f32 %v842_v52, %v1264_v41 }
 0x18f   : > { %289 = vperm.xlu1 %828, %v275_v44   ;;  %294 = vperm.xlu0 %827, %v276_v53  }
 0x190   : > { %v844_v59 = vpop.eup %843 }
 0x191   : > { %v468_v60 = vmul.f32 %v844_v59, %v1271_v48  ;;  %v521_v48 = vadd.f32 %v1264_v41, %v512_v16 }
 0x193   : > { %473 = vperm.xlu1 %828, %v467_v58   ;;  %478 = vperm.xlu0 %827, %v468_v60  }
 0x197   : > { %483 = vperm.xlu1 %828, %v469_v31  }
 0x19b   : > { %830 = vset.pattern.permute.xlu1 %v992_v24 }
 0x1b1   : > { %v337_v23 = vpop.permute.xlu0 %336 }
 0x1b3   : > { %v454_v61 = vpop.xlane.xlu1 %453 }
 0x1b4   : > { %v458_v63 = vmul.f32 0.00390625, %v454_v61 }
 0x1b6   : > { %v462_v35 = vadd.f32 1e-05, %v458_v63 }
 0x1b7   : > { %v514_v3 = vpop.permute.xlu1 %513 }
 0x1b8   : > { %845 = vrsqrt.f32 %v462_v35  ;;  %v522_v39 = vadd.f32 %v1290_v62, %v514_v3 }
 0x1ba   : > { %540 = vperm.xlu1 %830, %v522_v39  }
 0x1bb   : > { %v332_v25 = vpop.permute.xlu1 %331 }
 0x1bf   : > { %v342_v30 = vpop.permute.xlu1 %341 }
 0x1c3   : > { %v347_v40 = vpop.permute.xlu1 %346 }
 0x1c5   : > { %v846_v11 = vpop.eup %845 }
 0x1c6   : > { %v470_v38 = vmul.f32 %v846_v11, %v1290_v62 }
 0x1c8   : > { %488 = vperm.xlu0 %827, %v470_v38  }
 0x1cc   : > { %829 = vset.pattern.permute.xlu0 %v992_v24 }
 0x1cd   : > { %535 = vperm.xlu0 %829, %v521_v48  }
 0x1f3   : > { %v526_v29 = vpop.permute.xlu0 %525 }
 0x1f8   : > { %v280_v32 = vpop.permute.xlu0 %279 }
 0x1f9   : > { %v297_v33 = vmul.f32 %v280_v32, %v1186_v42  ;;  %v298_v34 = vmul.f32 %v280_v32, %v1189_v43 }
 0x1fb   : > { %v349_v36 = vadd.f32 %v332_v25, %v297_v33  ;;  %v350_v37 = vadd.f32 %v332_v25, %v298_v34 }
 0x1fd   : > { %v357_v26 = vmul.f32 0.5, %v349_v36  ;;  %v358_v62 = vmul.f32 0.5, %v350_v37 }
 0x1ff   : > { %847 = vtanh.f32 %v357_v26 }
 0x200   : > { %849 = vtanh.f32 %v358_v62  ;;  %v531_v41 = vpop.permute.xlu1 %530 }
 0x206   : > { %v285_v45 = vpop.permute.xlu1 %284 }
 0x207   : > { %v299_v24 = vmul.f32 %v285_v45, %v1226_v7  ;;  %v300_v49 = vmul.f32 %v285_v45, %v1229_v10 }
 0x209   : > { %v351_v44 = vadd.f32 %v337_v23, %v299_v24  ;;  %v352_v53 = vadd.f32 %v337_v23, %v300_v49 }
 0x20a   : > { %v290_v52 = vpop.permute.xlu1 %289  ;;  %v295_v58 = vpop.permute.xlu0 %294 }
 0x20b   : > { %v359_v42 = vmul.f32 0.5, %v351_v44  ;;  %v360_v59 = vmul.f32 0.5, %v352_v53  ;;  %v301_v43 = vmul.f32 %v290_v52, %v1192_v46  ;;  %v302_v60 = vmul.f32 %v290_v52, %v1195_v47 }
 0x20c   : > { %v848_v31 = vpop.eup %847  ;;  %v303_v61 = vmul.f32 %v295_v58, %v1232_v19  ;;  %v304_v63 = vmul.f32 %v295_v58, %v1235_v22 }
 0x20d   : > { %v850_v35 = vpop.eup %849  ;;  %v373_v3 = vmul.f32 0.5, %v848_v31  ;;  %851 = vtanh.f32 %v359_v42  ;;  %v353_v7 = vadd.f32 %v342_v30, %v301_v43  ;;  %v354_v10 = vadd.f32 %v342_v30, %v302_v60 }
 0x20e   : > { %v374_v39 = vmul.f32 0.5, %v850_v35  ;;  %853 = vtanh.f32 %v360_v59  ;;  %v355_v11 = vadd.f32 %v347_v40, %v303_v61  ;;  %v356_v38 = vadd.f32 %v347_v40, %v304_v63  ;;  %v474_v16 = vpop.permute.xlu1 %473  ;;  %v479_v48 = vpop.permute.xlu0 %478 }
 0x20f   : > { %v381_v23 = vadd.f32 0.5, %v373_v3  ;;  %v361_v46 = vmul.f32 0.5, %v353_v7  ;;  %v362_v47 = vmul.f32 0.5, %v354_v10  ;;  %v491_v25 = vmul.f32 %v474_v16, %v1202_v50 }
 0x210   : > { %v382_v19 = vadd.f32 0.5, %v374_v39  ;;  %v363_v32 = vmul.f32 0.5, %v355_v11  ;;  %v364_v22 = vmul.f32 0.5, %v356_v38  ;;  %v492_v33 = vmul.f32 %v474_v16, %v1205_v51 }
 0x211   : > { %v389_v34 = vmul.f32 %v381_v23, %v1107_v0  ;;  %855 = vtanh.f32 %v361_v46  ;;  %v543_v30 = vadd.f32 %v526_v29, %v491_v25  ;;  %v493_v36 = vmul.f32 %v479_v48, %v1242_v27 }
 0x212   : > { %v390_v37 = vmul.f32 %v382_v19, %v1109_v1  ;;  %857 = vtanh.f32 %v362_v47  ;;  %v544_v26 = vadd.f32 %v526_v29, %v492_v33  ;;  %v494_v62 = vmul.f32 %v479_v48, %v1245_v28 }
 0x213   : > { %591 = vst [vmem:[%s1327_s28] sm:$0xff] %v389_v34  ;;  %859 = vtanh.f32 %v363_v32  ;;  %v551_v50 = vmul.f32 0.5, %v543_v30  ;;  %v545_v51 = vadd.f32 %v531_v41, %v493_v36  ;;  %v484_v30 = vpop.permute.xlu1 %483 }
 0x214   : > { %592 = vst [vmem:[%s1327_s28 + $0x8] sm:$0xff] %v390_v37  ;;  %861 = vtanh.f32 %v364_v22  ;;  %v552_v0 = vmul.f32 0.5, %v544_v26  ;;  %v546_v40 = vadd.f32 %v531_v41, %v494_v62 }
 0x215   : > { %863 = vtanh.f32 %v551_v50  ;;  %v553_v27 = vmul.f32 0.5, %v545_v51  ;;  %v496_v50 = vmul.f32 %v484_v30, %v1215_v57 }
 0x216   : > { %865 = vtanh.f32 %v552_v0  ;;  %v554_v1 = vmul.f32 0.5, %v546_v40 }
 0x217   : > { %867 = vtanh.f32 %v553_v27 }
 0x218   : > { %869 = vtanh.f32 %v554_v1 }
 0x21a   : > { %v852_v28 = vpop.eup %851 }
 0x21b   : > { %v854_v29 = vpop.eup %853  ;;  %v375_v45 = vmul.f32 0.5, %v852_v28 }
 0x21c   : > { %v376_v24 = vmul.f32 0.5, %v854_v29 }
 0x21d   : > { %v383_v49 = vadd.f32 0.5, %v375_v45 }
 0x21e   : > { %v856_v44 = vpop.eup %855  ;;  %v384_v53 = vadd.f32 0.5, %v376_v24 }
 0x21f   : > { %v858_v52 = vpop.eup %857  ;;  %v391_v58 = vmul.f32 %v383_v49, %v1111_v2  ;;  %v377_v42 = vmul.f32 0.5, %v856_v44 }
 0x220   : > { %v860_v41 = vpop.eup %859  ;;  %v392_v59 = vmul.f32 %v384_v53, %v1115_v4  ;;  %v378_v43 = vmul.f32 0.5, %v858_v52 }
 0x221   : > { %v862_v60 = vpop.eup %861  ;;  %595 = vst [vmem:[%s1327_s28 + $0x20] sm:$0xff] %v391_v58  ;;  %v385_v31 = vadd.f32 0.5, %v377_v42  ;;  %v379_v61 = vmul.f32 0.5, %v860_v41 }
 0x222   : > { %v864_v63 = vpop.eup %863  ;;  %596 = vst [vmem:[%s1327_s28 + $0x28] sm:$0xff] %v392_v59  ;;  %v386_v35 = vadd.f32 0.5, %v378_v43  ;;  %v380_v3 = vmul.f32 0.5, %v862_v60 }
 0x223   : > { %v866_v7 = vpop.eup %865  ;;  %v393_v10 = vmul.f32 %v385_v31, %v1117_v5  ;;  %v387_v2 = vadd.f32 0.5, %v379_v61  ;;  %v567_v39 = vmul.f32 0.5, %v864_v63 }
 0x224   : > { %v868_v11 = vpop.eup %867  ;;  %v394_v4 = vmul.f32 %v386_v35, %v1119_v6  ;;  %v388_v38 = vadd.f32 0.5, %v380_v3  ;;  %v568_v16 = vmul.f32 0.5, %v866_v7 }
 0x225   : > { %v870_v48 = vpop.eup %869  ;;  %599 = vst [vmem:[%s1327_s28 + $0x40] sm:$0xff] %v393_v10  ;;  %v395_v23 = vmul.f32 %v387_v2, %v1123_v8  ;;  %v575_v46 = vadd.f32 0.5, %v567_v39  ;;  %v569_v47 = vmul.f32 0.5, %v868_v11 }
 0x226   : > { %600 = vst [vmem:[%s1327_s28 + $0x48] sm:$0xff] %v394_v4  ;;  %v396_v5 = vmul.f32 %v388_v38, %v1125_v9  ;;  %v576_v25 = vadd.f32 0.5, %v568_v16  ;;  %v570_v19 = vmul.f32 0.5, %v870_v48 }
 0x227   : > { %603 = vst [vmem:[%s1327_s28 + $0x60] sm:$0xff] %v395_v23  ;;  %v583_v6 = vmul.f32 %v1131_v12, %v575_v46  ;;  %v577_v32 = vadd.f32 0.5, %v569_v47 }
 0x228   : > { %604 = vst [vmem:[%s1327_s28 + $0x68] sm:$0xff] %v396_v5  ;;  %v584_v22 = vmul.f32 %v1133_v13, %v576_v25  ;;  %v578_v33 = vadd.f32 0.5, %v570_v19  ;;  %v495_v13 = vmul.f32 %v484_v30, %v1212_v56 }
 0x229   : > { %593 = vst [vmem:[%s1327_s28 + $0x10] sm:$0xff] %v583_v6  ;;  %v585_v8 = vmul.f32 %v1135_v14, %v577_v32 }
 0x22a   : > { %594 = vst [vmem:[%s1327_s28 + $0x18] sm:$0xff] %v584_v22  ;;  %v586_v34 = vmul.f32 %v1137_v15, %v578_v33 }
 0x22b   : > { %597 = vst [vmem:[%s1327_s28 + $0x30] sm:$0xff] %v585_v8 }
 0x22c   : > { %598 = vst [vmem:[%s1327_s28 + $0x38] sm:$0xff] %v586_v34 }
 0x235   : > { %v541_v12 = vpop.permute.xlu1 %540 }
 0x243   : > { %v489_v9 = vpop.permute.xlu0 %488 }
 0x244   : > { %v497_v36 = vmul.f32 %v489_v9, %v1277_v54  ;;  %v498_v37 = vmul.f32 %v489_v9, %v1280_v55 }
 0x246   : > { %v549_v26 = vadd.f32 %v541_v12, %v497_v36  ;;  %v550_v62 = vadd.f32 %v541_v12, %v498_v37 }
 0x248   : > { %v557_v51 = vmul.f32 0.5, %v549_v26  ;;  %v558_v14 = vmul.f32 0.5, %v550_v62  ;;  %v536_v0 = vpop.permute.xlu0 %535 }
 0x249   : > { %v547_v40 = vadd.f32 %v536_v0, %v495_v13  ;;  %v548_v15 = vadd.f32 %v536_v0, %v496_v50 }
 0x24a   : > { %871 = vtanh.f32 %v557_v51 }
 0x24b   : > { %873 = vtanh.f32 %v558_v14  ;;  %v555_v27 = vmul.f32 0.5, %v547_v40  ;;  %v556_v54 = vmul.f32 0.5, %v548_v15 }
 0x24d   : > { %875 = vtanh.f32 %v555_v27 }
 0x24e   : > { %877 = vtanh.f32 %v556_v54 }
 0x257   : > { %v872_v55 = vpop.eup %871 }
 0x258   : > { %v874_v1 = vpop.eup %873  ;;  %v573_v56 = vmul.f32 0.5, %v872_v55 }
 0x259   : > { %v574_v28 = vmul.f32 0.5, %v874_v1 }
 0x25a   : > { %v876_v57 = vpop.eup %875  ;;  %v581_v29 = vadd.f32 0.5, %v573_v56 }
 0x25b   : > { %v878_v45 = vpop.eup %877  ;;  %v582_v24 = vadd.f32 0.5, %v574_v28  ;;  %v571_v49 = vmul.f32 0.5, %v876_v57 }
 0x25c   : > { %v589_v44 = vmul.f32 %v1147_v20, %v581_v29  ;;  %v572_v53 = vmul.f32 0.5, %v878_v45 }
 0x25d   : > { %v590_v52 = vmul.f32 %v1149_v21, %v582_v24  ;;  %v579_v58 = vadd.f32 0.5, %v571_v49 }
 0x25e   : > { %605 = vst [vmem:[%s1327_s28 + $0x70] sm:$0xff] %v589_v44  ;;  %v580_v42 = vadd.f32 0.5, %v572_v53 }
 0x25f   : > { %606 = vst [vmem:[%s1327_s28 + $0x78] sm:$0xff] %v590_v52  ;;  %v587_v41 = vmul.f32 %v1141_v17, %v579_v58 }
 0x260   : > { %v588_v20 = vmul.f32 %v1143_v18, %v580_v42 }
 0x261   : > { %601 = vst [vmem:[%s1327_s28 + $0x50] sm:$0xff] %v587_v41 }
 0x262   : > { %602 = vst [vmem:[%s1327_s28 + $0x58] sm:$0xff] %v588_v20 }
 0x263   : > { %920 = shalt.err (!%p917_p6)
}
 0x264   : > { %s921_s15 = scalar_lea.hbm %s1365_s4, 2048  ;;  %s925_s19 = scalar_lea.hbm %s1420_s2, 4096 }
 0x265   : > { %p922_p7 = scmp.ne.s32.totalorder %s1365_s4, %s921_s15  ;;  %p926_p13 = scmp.lt.s32.totalorder %s1365_s4, %s1420_s2 }
 0x266   : > { %p927_p2 = scmp.lt.s32.totalorder %s925_s19, %s921_s15 }
 0x267   : > { %p923_p10 = pnand %p922_p7, %p1064_p9 }
 0x268   : > { %p928_p8 = por %p927_p2, %p926_p13 }
 0x269   : > { %p924_p4 = pneg %p923_p10 }
 0x26b   : > { %p929_p12 = pnand %p928_p8, %p924_p4 }
 0x26d   : > { %932 = shalt.err (!%p929_p12)
}
 0x26e   : > { %s996_s21 = smov 512   ;;  %s997_s28 = smov 32  }
 0x26f   : > { %758 = dma.vmem_to_hbm [thread:$0]  (%p1064_p9), %s1367_s29, 2048, %s1365_s4, %s608_s12, %s996_s21, %s996_s21, %s997_s28  }
 0x270 PF: > { %s639_s25 = sand.u32 1, %s967_s9   ;;  %p1426_p0 = scmp.ge.s32.totalorder %s987_s14, 2 }
 0x271   : > { %s640_s30 = scalar_lea.sflag [#allocation4], %s639_s25 }
 0x272   : > { %p765_p1 = pnand %p1426_p0, %p1071_p11 }
 0x274   : > { %p766_p3 = pneg %p765_p1 }
 0x276   : > { %962 = dma.done.wait (%p766_p3), %s640_s30, 2048  }
 0x277   : > { %964 = vsyncadd (%p766_p3), %s640_s30, 4294965248  ;;  %s18_s14 = sadd.s32 1, %s987_s14   ;;  %s1427_s9 = smov %s971_s10 }
 0x278   : > { %p15_p5 = scmp.ge.s32.totalorder %s18_s14, 4   ;;  %s1428_s10 = smov %s975_s11 }
 0x279   : > { %s1429_s11 = smov %s1069_s23  ;;  %s1430_s12 = smov %s983_s13 }
 0x27a   : > { %s1431_s13 = smov %s1433_s17  ;;  %17 = sbr.rel (!%p15_p5) target bundleno = 6 (0x6), region = 78 }
 0x27f   :  { %645 = vsyncpa [#allocation3], 1 }
 0x280   :  { %647 = vsyncpa [#allocation3 + $0x1], 1 }
 0x281   :  { %648 = vsyncpa [#allocation4], 1 }
 0x282   :  { %650 = vsyncpa [#allocation4 + $0x1], 1 }

</bundles_post_ra>
